<compile_context>
chip_gen: v5e
topology: v5e:2x2
jax: 0.10.0
libtpu: 0.0.40
codegen_flags: <defaults>
</compile_context>

<pallas_src>
import functools

import jax
import jax.numpy as jnp
from jax.experimental import pallas as pl
from jax.experimental.pallas import tpu as pltpu

EPS = 1e-5            # torch.nn.BatchNorm1d default eps
_LANE = 128           # TPU lane width; output tiles kept lane-dense
_CH_ALIGN = 16        # bf16 packs 16 sublanes per vreg -> pad channels to 16


def _round_up(x, m):
    return (x + m - 1) // m * m


def _halo_block_width(halo, lt):
    """Smallest multiple of 128 that divides lt and is >= halo."""
    for d in range(_LANE, lt + 1, _LANE):
        if lt % d == 0 and d >= halo:
            return d
    raise ValueError(f"halo {halo} does not fit in length tile {lt}")


def _default_vmem_limit():
    """Generation-aware scoped-VMEM limit (3/4 of physical, capped at 96 MiB)."""
    try:
        cap = int(pltpu.get_tpu_info().vmem_capacity_bytes)
    except Exception:
        cap = 64 * 1024 * 1024            # conservative: v7x per-TC VMEM
    return min(96 * 1024 * 1024, cap * 3 // 4)


# -----------------------------------------------------------------------------
# Fused TemporalBlock kernel.  One grid step = one (batch element, length tile).
# -----------------------------------------------------------------------------
def _make_block_kernel(*, K, dilation, pad, lt, hr, seq_len, has_downsample):
    halo = dilation * (K - 1)             # == 2 * pad
    W = lt + 2 * hr                        # assembled window width (lane multiple)
    l_h1 = _round_up(lt + halo, _LANE)     # lane-aligned conv1 working width
    off = hr - halo                        # window column of abs position t0 - halo

    def kernel(*refs):
        if has_downsample:
            (xl_ref, xc_ref, xr_ref, w1_ref, b1_ref, w2_ref, b2_ref,
             wd_ref, bd_ref, o_ref) = refs
        else:
            (xl_ref, xc_ref, xr_ref, w1_ref, b1_ref, w2_ref, b2_ref, o_ref) = refs

        t0 = pl.program_id(1) * lt         # tile start in original coordinates

        # Assemble the haloed bf16 input window: window col w <-> abs pos t0 - hr + w.
        # Halo blocks are clamped at the array ends by the index maps, so mask every
        # column whose absolute position falls outside [0, seq_len) (this also
        # reproduces Conv1d's zero padding of x).
        xw = jnp.concatenate([xl_ref[...], xc_ref[...], xr_ref[...]], axis=1)
        pos_x = t0 - hr + jax.lax.broadcasted_iota(jnp.int32, (1, W), 1)
        xw = jnp.where((pos_x >= 0) & (pos_x < seq_len), xw, jnp.zeros_like(xw))

        # conv1 (+folded BN1): bf16 im2col along the sublane axis -> one single
        # K*Cin-contraction matmul on the MXU (bf16 operands, f32 accumulation).
        x_cat = jnp.concatenate(
            [xw[:, off + i * dilation: off + i * dilation + l_h1] for i in range(K)],
            axis=0)
        h1 = jnp.dot(w1_ref[...], x_cat, preferred_element_type=jnp.float32)
        h1 = h1 + b1_ref[...]
        # Fused relu + "zero outside [0, seq_len)" mask (conv2 sees a zero-padded h1,
        # exactly like PyTorch), then a single cast to bf16 feeding conv2.
        pos_h = t0 - pad + jax.lax.broadcasted_iota(jnp.int32, (1, l_h1), 1)
        h1 = jnp.where((h1 > 0.0) & (pos_h >= 0) & (pos_h < seq_len),
                       h1, 0.0).astype(jnp.bfloat16)

        # conv2 (+folded BN2): same single-matmul scheme over the in-VMEM h1.
        h1_cat = jnp.concatenate(
            [h1[:, i * dilation: i * dilation + lt] for i in range(K)], axis=0)
        h2 = jnp.dot(w2_ref[...], h1_cat, preferred_element_type=jnp.float32)
        h2 = jnp.maximum(h2 + b2_ref[...], 0.0)

        # Residual: identity skip, or 1x1 conv when n_in != n_out (PyTorch rule).
        x_mid = xw[:, hr:hr + lt]
        if has_downsample:
            res = jnp.dot(wd_ref[...], x_mid,
                          preferred_element_type=jnp.float32) + bd_ref[...]
        else:
            res = x_mid.astype(jnp.float32)

        o_ref[...] = jnp.maximum(h2 + res, 0.0).astype(o_ref.dtype)

    return kernel


# -----------------------------------------------------------------------------
# Host-side wrappers
# -----------------------------------------------------------------------------
def _fold_bn(w, b, g, beta, mu, var, eps=EPS):
    """Fold eval-mode BatchNorm1d into the preceding Conv1d (exact)."""
    s = g * jax.lax.rsqrt(var + eps)
    return w * s[:, None, None], (b - mu) * s + beta


def _temporal_block(h, p, *, seq_len, kernel_size, dilation, padding, lt, vmem_limit):
    """One TemporalBlock (eval mode) on the padded canonical layout.

    h: (B, c_in_p, L_p) bf16 -> (B, c_out_p, L_p) bf16.  Columns >= seq_len of the
    output are junk but are never read by later layers (in-kernel position mask)."""
    B, c_in_p, L_p = h.shape
    K = kernel_size
    c_out, c_in, Kw = p["w1"].shape
    assert Kw == K and c_in_p == _round_up(c_in, _CH_ALIGN)
    # The residual add only type-checks when the convs preserve the length.
    assert 2 * padding == dilation * (K - 1), "need length-preserving padding"
    c_out_p = _round_up(c_out, _CH_ALIGN)
    has_ds = "wd" in p
    assert has_ds or c_in == c_out, "identity skip requires n_in == n_out"

    halo = 2 * padding
    hr = _halo_block_width(halo, lt)      # lane-aligned halo block width, divides lt
    n_t = L_p // lt
    nb = lt // hr

    # Fold BN, pad channels to 16, flatten conv weights tap-major so the kernel can
    # do one matmul per conv.
    w1f, b1f = _fold_bn(p["w1"], p["b1"], p["g1"], p["bt1"], p["mu1"], p["var1"])
    w2f, b2f = _fold_bn(p["w2"], p["b2"], p["g2"], p["bt2"], p["mu2"], p["var2"])

    def flat_w(w, ci_p):   # (Cout, Cin, K) -> (Cout_p, K*Cin_p) bf16, cols = [tap, cin]
        co, ci, k = w.shape
        w = jnp.pad(w, ((0, c_out_p - co), (0, ci_p - ci), (0, 0)))
        return jnp.transpose(w, (0, 2, 1)).reshape(c_out_p, k * ci_p).astype(jnp.bfloat16)

    def col(b):            # (Cout,) -> (Cout_p, 1) f32
        return jnp.pad(b, (0, c_out_p - b.shape[0])).reshape(c_out_p, 1).astype(jnp.float32)

    weights = [flat_w(w1f, c_in_p), col(b1f), flat_w(w2f, c_out_p), col(b2f)]
    if has_ds:
        wd = jnp.pad(p["wd"], ((0, c_out_p - c_out), (0, c_in_p - c_in))).astype(jnp.bfloat16)
        weights += [wd, col(p["bd"])]

    kernel = _make_block_kernel(K=K, dilation=dilation, pad=padding, lt=lt, hr=hr,
                                seq_len=seq_len, has_downsample=has_ds)

    def const_spec(shape):
        # TODO(synk): pipeline_mode=pl.Buffered(1) would halve weight VMEM (the blocks
        # are grid-invariant); left at the default to keep compilation conservative.
        return pl.BlockSpec(shape, lambda b, t: (0,) * len(shape))

    # The haloed receptive field is composed in-kernel from 3 Blocked tiles of the
    # SAME HBM activation array: a small left halo block, the centre tile, a small
    # right halo block.  Index maps clamp at the ends; the kernel masks those columns.
    x_left = pl.BlockSpec((None, c_in_p, hr),
                          lambda b, t: (b, 0, jnp.maximum(t * nb - 1, 0)))
    x_center = pl.BlockSpec((None, c_in_p, lt), lambda b, t: (b, 0, t))
    x_right = pl.BlockSpec((None, c_in_p, hr),
                           lambda b, t: (b, 0, jnp.minimum(t * nb + nb, n_t * nb - 1)))

    in_specs = [x_left, x_center, x_right,
                const_spec((c_out_p, K * c_in_p)), const_spec((c_out_p, 1)),
                const_spec((c_out_p, K * c_out_p)), const_spec((c_out_p, 1))]
    if has_ds:
        in_specs += [const_spec((c_out_p, c_in_p)), const_spec((c_out_p, 1))]

    return pl.pallas_call(
        kernel,
        out_shape=jax.ShapeDtypeStruct((B, c_out_p, L_p), jnp.bfloat16),
        grid=(B, n_t),
        in_specs=in_specs,
        out_specs=pl.BlockSpec((None, c_out_p, lt), lambda b, t: (b, 0, t)),
        compiler_params=pltpu.CompilerParams(
            dimension_semantics=("parallel", "parallel"),
            vmem_limit_bytes=vmem_limit),
    )(h, h, h, *weights)


@functools.partial(jax.jit, static_argnames=("kernel_size", "l_tile"))
def temporal_conv_net_forward(x, layer_params, *, kernel_size=3, l_tile=1024):
    """TemporalConvNet forward (eval mode).  x: (B, input_dim, L) -> (B, C_last, L)."""
    # TODO(synk): training-mode Dropout / batch-statistics BatchNorm not implemented
    # (eval-mode semantics only).
    # TODO(synk): the PyTorch module's own padding=(k-1)*dilation (no Chomp1d) makes
    # the residual add shape-mismatch for k>1; the length-preserving symmetric
    # padding below is the only configuration in which the reference forward runs.
    B, input_dim, L = x.shape
    n_layers = len(layer_params)
    max_halo = (kernel_size - 1) * (2 ** (n_layers - 1))

    lt = min(_round_up(l_tile, _LANE), _round_up(L, _LANE))
    lt = max(lt, _round_up(max(max_halo, 1), _LANE))   # deepest layer's halo must fit
    n_t = pl.cdiv(L, lt)
    L_p = n_t * lt
    vmem_limit = _default_vmem_limit()

    # Canonical padded inter-layer layout: (B, C_p, L_p) bf16.  Padded once here;
    # no per-layer host-side re-pads / slices / window stacking afterwards.
    c0_p = _round_up(input_dim, _CH_ALIGN)
    h = jnp.pad(x.astype(jnp.bfloat16),
                ((0, 0), (0, c0_p - input_dim), (0, L_p - L)))

    for i, p in enumerate(layer_params):
        dilation = 2 ** i
        padding = dilation * (kernel_size - 1) // 2
        h = _temporal_block(h, p, seq_len=L, kernel_size=kernel_size,
                            dilation=dilation, padding=padding,
                            lt=lt, vmem_limit=vmem_limit)

    c_last = layer_params[-1]["w1"].shape[0]
    return h[:, :c_last, :L].astype(x.dtype)


# -----------------------------------------------------------------------------
# Pure-JAX reference (mimics the kernel's bf16 rounding points for a tight check)
# -----------------------------------------------------------------------------
def _rb(v):  # round-trip through bf16
    return v.astype(jnp.bfloat16).astype(jnp.float32)


def _ref_conv1d(z, w, b, pad, dil):
    K = w.shape[-1]
    zp = jnp.pad(z, ((0, 0), (0, 0), (pad, pad)))
    L_out = z.shape[-1] + 2 * pad - dil * (K - 1)
    acc = jnp.zeros((z.shape[0], w.shape[0], L_out), jnp.float32)
    for t in range(K):
        acc = acc + jnp.einsum("oi,bil->bol", w[:, :, t],
                               zp[:, :, t * dil:t * dil + L_out],
                               precision=jax.lax.Precision.HIGHEST)
    return acc + b[None, :, None]


def _ref_block(x, p, *, kernel_size, dilation, padding):
    w1f, b1f = _fold_bn(p["w1"], p["b1"], p["g1"], p["bt1"], p["mu1"], p["var1"])
    w2f, b2f = _fold_bn(p["w2"], p["b2"], p["g2"], p["bt2"], p["mu2"], p["var2"])
    xr = _rb(x)
    h1 = _rb(jax.nn.relu(_ref_conv1d(xr, _rb(w1f), b1f, padding, dilation)))
    h2 = jax.nn.relu(_ref_conv1d(h1, _rb(w2f), b2f, padding, dilation))
    if "wd" in p:
        res = jnp.einsum("oi,bil->bol", _rb(p["wd"]), xr,
                         precision=jax.lax.Precision.HIGHEST) + p["bd"][None, :, None]
    else:
        res = xr
    return _rb(jax.nn.relu(h2 + res))


def _ref_net(x, layer_params, *, kernel_size=3):
    h = x
    for i, p in enumerate(layer_params):
        d = 2 ** i
        h = _ref_block(h, p, kernel_size=kernel_size, dilation=d,
                       padding=d * (kernel_size - 1) // 2)
    return h


# -----------------------------------------------------------------------------
if __name__ == "__main__":
    kernel_size = 3
    f32 = jnp.float32

    def make_block(key, c_in, c_out):
        ks = jax.random.split(key, 14)
        p = {
            "w1": 0.3 * jax.random.normal(ks[0], (c_out, c_in, kernel_size), f32),
            "b1": 0.1 * jax.random.normal(ks[1], (c_out,), f32),
            "g1": 1.0 + 0.1 * jax.random.normal(ks[2], (c_out,), f32),
            "bt1": 0.1 * jax.random.normal(ks[3], (c_out,), f32),
            "mu1": 0.1 * jax.random.normal(ks[4], (c_out,), f32),
            "var1": jax.random.uniform(ks[5], (c_out,), f32, 0.5, 1.5),
            "w2": 0.3 * jax.random.normal(ks[6], (c_out, c_out, kernel_size), f32),
            "b2": 0.1 * jax.random.normal(ks[7], (c_out,), f32),
            "g2": 1.0 + 0.1 * jax.random.normal(ks[8], (c_out,), f32),
            "bt2": 0.1 * jax.random.normal(ks[9], (c_out,), f32),
            "mu2": 0.1 * jax.random.normal(ks[10], (c_out,), f32),
            "var2": jax.random.uniform(ks[11], (c_out,), f32, 0.5, 1.5),
        }
        if c_in != c_out:   # PyTorch: downsample = Conv1d(c_in, c_out, 1) iff c_in != c_out
            p["wd"] = 0.3 * jax.random.normal(ks[12], (c_out, c_in), f32)
            p["bd"] = 0.1 * jax.random.normal(ks[13], (c_out,), f32)
        return p

    def run_case(seed, B, input_dim, L, num_channels, l_tile):
        keys = jax.random.split(jax.random.PRNGKey(seed), len(num_channels) + 1)
        x = jax.random.normal(keys[0], (B, input_dim, L), f32)
        layer_params = tuple(
            make_block(keys[i + 1],
                       input_dim if i == 0 else num_channels[i - 1],
                       num_channels[i])
            for i in range(len(num_channels)))
        out = temporal_conv_net_forward(x, layer_params,
                                        kernel_size=kernel_size, l_tile=l_tile)
        out = jax.block_until_ready(out).astype(f32)
        ref = _ref_net(x, layer_params, kernel_size=kernel_size)
        assert out.shape == (B, num_channels[-1], L), out.shape
        max_err = float(jnp.max(jnp.abs(out - ref)))
        assert jnp.allclose(out, ref, atol=5e-2, rtol=5e-2), max_err

    # Small canonical case: layer 0 has a 1x1 downsample skip, layer 1 identity skip.
    run_case(seed=0, B=2, input_dim=4, L=16, num_channels=[8, 8], l_tile=1024)
    # Multi-tile case: 3 length tiles, ragged tail, odd channel counts, both skips.
    run_case(seed=1, B=2, input_dim=3, L=300, num_channels=[8, 5], l_tile=128)

    print("KERNEL_OK")
</pallas_src>

<mosaic_0001>
module attributes {stable_mosaic.version = 11 : i64} {
  func.func @kernel(%arg0: i32, %arg1: i32, %arg2: memref<1x16x128xbf16, #tpu.memory_space<vmem>>, %arg3: memref<1x16x128xbf16, #tpu.memory_space<vmem>>, %arg4: memref<1x16x128xbf16, #tpu.memory_space<vmem>>, %arg5: memref<16x48xbf16, #tpu.memory_space<vmem>>, %arg6: memref<16x1xf32, #tpu.memory_space<vmem>>, %arg7: memref<16x48xbf16, #tpu.memory_space<vmem>>, %arg8: memref<16x1xf32, #tpu.memory_space<vmem>>, %arg9: memref<16x16xbf16, #tpu.memory_space<vmem>>, %arg10: memref<16x1xf32, #tpu.memory_space<vmem>>, %arg11: memref<1x16x128xbf16, #tpu.memory_space<vmem>>) attributes {dimension_semantics = [#tpu.dimension_semantics<parallel>, #tpu.dimension_semantics<parallel>], iteration_bounds = array<i64: 2, 1>, scalar_prefetch = 0 : i64, scratch_operands = 0 : i64, tpu.core_type = #tpu.core_type<tc>, window_params = [{transform_indices = @transform_0, window_bounds = array<i64: 1, 16, 128>}, {transform_indices = @transform_1, window_bounds = array<i64: 1, 16, 128>}, {transform_indices = @transform_2, window_bounds = array<i64: 1, 16, 128>}, {pipeline_mode = #tpu.pipeline_mode<synchronous>, transform_indices = @transform_3, window_bounds = array<i64: 16, 48>}, {pipeline_mode = #tpu.pipeline_mode<synchronous>, transform_indices = @transform_4, window_bounds = array<i64: 16, 1>}, {pipeline_mode = #tpu.pipeline_mode<synchronous>, transform_indices = @transform_5, window_bounds = array<i64: 16, 48>}, {pipeline_mode = #tpu.pipeline_mode<synchronous>, transform_indices = @transform_6, window_bounds = array<i64: 16, 1>}, {pipeline_mode = #tpu.pipeline_mode<synchronous>, transform_indices = @transform_7, window_bounds = array<i64: 16, 16>}, {pipeline_mode = #tpu.pipeline_mode<synchronous>, transform_indices = @transform_8, window_bounds = array<i64: 16, 1>}, {transform_indices = @transform_9, window_bounds = array<i64: 1, 16, 128>}]} {
    %c128_i32 = arith.constant 128 : i32
    %0 = arith.muli %arg1, %c128_i32 : i32
    %c0 = arith.constant 0 : index
    %c0_0 = arith.constant 0 : index
    %c0_1 = arith.constant 0 : index
    %1 = vector.load %arg2[%c0, %c0_0, %c0_1] : memref<1x16x128xbf16, #tpu.memory_space<vmem>>, vector<1x16x128xbf16>
    %2 = vector.shape_cast %1 : vector<1x16x128xbf16> to vector<16x128xbf16>
    %c0_2 = arith.constant 0 : index
    %c0_3 = arith.constant 0 : index
    %c0_4 = arith.constant 0 : index
    %3 = vector.load %arg3[%c0_2, %c0_3, %c0_4] : memref<1x16x128xbf16, #tpu.memory_space<vmem>>, vector<1x16x128xbf16>
    %4 = vector.shape_cast %3 : vector<1x16x128xbf16> to vector<16x128xbf16>
    %c0_5 = arith.constant 0 : index
    %c0_6 = arith.constant 0 : index
    %c0_7 = arith.constant 0 : index
    %5 = vector.load %arg4[%c0_5, %c0_6, %c0_7] : memref<1x16x128xbf16, #tpu.memory_space<vmem>>, vector<1x16x128xbf16>
    %6 = vector.shape_cast %5 : vector<1x16x128xbf16> to vector<16x128xbf16>
    %7 = tpu.concatenate %2, %4, %6 in 1 : vector<16x128xbf16>, vector<16x128xbf16>, vector<16x128xbf16> -> vector<16x384xbf16>
    %c128_i32_8 = arith.constant 128 : i32
    %8 = arith.subi %0, %c128_i32_8 : i32
    %9 = tpu.iota {dimensions = array<i32: 1>} : vector<1x384xi32>
    %10 = vector.broadcast %8 : i32 to vector<1x384xi32>
    %11 = arith.addi %10, %9 : vector<1x384xi32>
    %c0_i32 = arith.constant 0 : i32
    %12 = vector.broadcast %c0_i32 : i32 to vector<1x384xi32>
    %13 = arith.cmpi sge, %11, %12 : vector<1x384xi32>
    %c16_i32 = arith.constant 16 : i32
    %14 = vector.broadcast %c16_i32 : i32 to vector<1x384xi32>
    %15 = arith.cmpi slt, %11, %14 : vector<1x384xi32>
    %16 = arith.andi %13, %15 : vector<1x384xi1>
    %cst = arith.constant 0.000000e+00 : bf16
    %17 = vector.broadcast %cst : bf16 to vector<16x384xbf16>
    %18 = vector.shape_cast %16 : vector<1x384xi1> to vector<1x384xi1>
    %19 = vector.broadcast %18 : vector<1x384xi1> to vector<16x384xi1>
    %20 = arith.select %19, %7, %17 : vector<16x384xi1>, vector<16x384xbf16>
    %21 = vector.extract_strided_slice %20 {offsets = [0, 126], sizes = [16, 256], strides = [1, 1]} : vector<16x384xbf16> to vector<16x256xbf16>
    %22 = vector.extract_strided_slice %20 {offsets = [0, 127], sizes = [16, 256], strides = [1, 1]} : vector<16x384xbf16> to vector<16x256xbf16>
    %23 = vector.extract_strided_slice %20 {offsets = [0, 128], sizes = [16, 256], strides = [1, 1]} : vector<16x384xbf16> to vector<16x256xbf16>
    %24 = tpu.concatenate %21, %22, %23 in 0 : vector<16x256xbf16>, vector<16x256xbf16>, vector<16x256xbf16> -> vector<48x256xbf16>
    %c0_9 = arith.constant 0 : index
    %c0_10 = arith.constant 0 : index
    %25 = vector.load %arg5[%c0_9, %c0_10] : memref<16x48xbf16, #tpu.memory_space<vmem>>, vector<16x48xbf16>
    %cst_11 = arith.constant dense<0.000000e+00> : vector<16x256xf32>
    %26 = tpu.matmul %25, %24, %cst_11 {dimension_numbers = #tpu.dot_dimension_numbers<[1], [0], [0], [1], [0, 0, 1, 1], [], []>} : vector<16x48xbf16>, vector<48x256xbf16>, vector<16x256xf32> -> vector<16x256xf32>
    %c0_12 = arith.constant 0 : index
    %c0_13 = arith.constant 0 : index
    %27 = vector.load %arg6[%c0_12, %c0_13] : memref<16x1xf32, #tpu.memory_space<vmem>>, vector<16x1xf32>
    %28 = vector.broadcast %27 : vector<16x1xf32> to vector<16x256xf32>
    %29 = arith.addf %26, %28 : vector<16x256xf32>
    %c1_i32 = arith.constant 1 : i32
    %30 = arith.subi %0, %c1_i32 : i32
    %31 = tpu.iota {dimensions = array<i32: 1>} : vector<1x256xi32>
    %32 = vector.broadcast %30 : i32 to vector<1x256xi32>
    %33 = arith.addi %32, %31 : vector<1x256xi32>
    %cst_14 = arith.constant 0.000000e+00 : f32
    %34 = vector.broadcast %cst_14 : f32 to vector<16x256xf32>
    %35 = arith.cmpf ogt, %29, %34 : vector<16x256xf32>
    %c0_i32_15 = arith.constant 0 : i32
    %36 = vector.broadcast %c0_i32_15 : i32 to vector<1x256xi32>
    %37 = arith.cmpi sge, %33, %36 : vector<1x256xi32>
    %38 = vector.broadcast %37 : vector<1x256xi1> to vector<16x256xi1>
    %39 = arith.andi %35, %38 : vector<16x256xi1>
    %c16_i32_16 = arith.constant 16 : i32
    %40 = vector.broadcast %c16_i32_16 : i32 to vector<1x256xi32>
    %41 = arith.cmpi slt, %33, %40 : vector<1x256xi32>
    %42 = vector.broadcast %41 : vector<1x256xi1> to vector<16x256xi1>
    %43 = arith.andi %39, %42 : vector<16x256xi1>
    %cst_17 = arith.constant 0.000000e+00 : f32
    %44 = vector.broadcast %cst_17 : f32 to vector<16x256xf32>
    %45 = arith.select %43, %29, %44 : vector<16x256xi1>, vector<16x256xf32>
    %46 = arith.truncf %45 : vector<16x256xf32> to vector<16x256xbf16>
    %47 = vector.extract_strided_slice %46 {offsets = [0, 0], sizes = [16, 128], strides = [1, 1]} : vector<16x256xbf16> to vector<16x128xbf16>
    %48 = vector.extract_strided_slice %46 {offsets = [0, 1], sizes = [16, 128], strides = [1, 1]} : vector<16x256xbf16> to vector<16x128xbf16>
    %49 = vector.extract_strided_slice %46 {offsets = [0, 2], sizes = [16, 128], strides = [1, 1]} : vector<16x256xbf16> to vector<16x128xbf16>
    %50 = tpu.concatenate %47, %48, %49 in 0 : vector<16x128xbf16>, vector<16x128xbf16>, vector<16x128xbf16> -> vector<48x128xbf16>
    %c0_18 = arith.constant 0 : index
    %c0_19 = arith.constant 0 : index
    %51 = vector.load %arg7[%c0_18, %c0_19] : memref<16x48xbf16, #tpu.memory_space<vmem>>, vector<16x48xbf16>
    %cst_20 = arith.constant dense<0.000000e+00> : vector<16x128xf32>
    %52 = tpu.matmul %51, %50, %cst_20 {dimension_numbers = #tpu.dot_dimension_numbers<[1], [0], [0], [1], [0, 0, 1, 1], [], []>} : vector<16x48xbf16>, vector<48x128xbf16>, vector<16x128xf32> -> vector<16x128xf32>
    %c0_21 = arith.constant 0 : index
    %c0_22 = arith.constant 0 : index
    %53 = vector.load %arg8[%c0_21, %c0_22] : memref<16x1xf32, #tpu.memory_space<vmem>>, vector<16x1xf32>
    %54 = vector.broadcast %53 : vector<16x1xf32> to vector<16x128xf32>
    %55 = arith.addf %52, %54 : vector<16x128xf32>
    %cst_23 = arith.constant 0.000000e+00 : f32
    %56 = vector.broadcast %cst_23 : f32 to vector<16x128xf32>
    %57 = arith.maximumf %55, %56 : vector<16x128xf32>
    %58 = vector.extract_strided_slice %20 {offsets = [0, 128], sizes = [16, 128], strides = [1, 1]} : vector<16x384xbf16> to vector<16x128xbf16>
    %c0_24 = arith.constant 0 : index
    %c0_25 = arith.constant 0 : index
    %59 = vector.load %arg9[%c0_24, %c0_25] : memref<16x16xbf16, #tpu.memory_space<vmem>>, vector<16x16xbf16>
    %cst_26 = arith.constant dense<0.000000e+00> : vector<16x128xf32>
    %60 = tpu.matmul %59, %58, %cst_26 {dimension_numbers = #tpu.dot_dimension_numbers<[1], [0], [0], [1], [0, 0, 1, 1], [], []>} : vector<16x16xbf16>, vector<16x128xbf16>, vector<16x128xf32> -> vector<16x128xf32>
    %c0_27 = arith.constant 0 : index
    %c0_28 = arith.constant 0 : index
    %61 = vector.load %arg10[%c0_27, %c0_28] : memref<16x1xf32, #tpu.memory_space<vmem>>, vector<16x1xf32>
    %62 = vector.broadcast %61 : vector<16x1xf32> to vector<16x128xf32>
    %63 = arith.addf %60, %62 : vector<16x128xf32>
    %64 = arith.addf %57, %63 : vector<16x128xf32>
    %cst_29 = arith.constant 0.000000e+00 : f32
    %65 = vector.broadcast %cst_29 : f32 to vector<16x128xf32>
    %66 = arith.maximumf %64, %65 : vector<16x128xf32>
    %67 = arith.truncf %66 : vector<16x128xf32> to vector<16x128xbf16>
    %c0_30 = arith.constant 0 : index
    %c0_31 = arith.constant 0 : index
    %c0_32 = arith.constant 0 : index
    %68 = vector.load %arg11[%c0_30, %c0_31, %c0_32] : memref<1x16x128xbf16, #tpu.memory_space<vmem>>, vector<1x16x128xbf16>
    %69 = vector.shape_cast %68 : vector<1x16x128xbf16> to vector<16x128xbf16>
    %70 = vector.shape_cast %67 : vector<16x128xbf16> to vector<1x16x128xbf16>
    tpu.vector_store %arg11[%c0_30, %c0_31, %c0_32], %70 {strides = array<i32>} : memref<1x16x128xbf16, #tpu.memory_space<vmem>>, vector<1x16x128xbf16>,
    return
  }
  func.func @transform_0(%arg0: i32, %arg1: i32) -> (i32, i32, i32) {
    %c1_i32 = arith.constant 1 : i32
    %0 = arith.muli %arg1, %c1_i32 : i32
    %c1_i32_0 = arith.constant 1 : i32
    %1 = arith.subi %0, %c1_i32_0 : i32
    %c0_i32 = arith.constant 0 : i32
    %2 = arith.maxsi %1, %c0_i32 : i32
    %c0_i32_1 = arith.constant 0 : i32
    %c0_i32_2 = arith.constant 0 : i32
    return %arg0, %c0_i32_1, %2 : i32, i32, i32
  }
  func.func @transform_1(%arg0: i32, %arg1: i32) -> (i32, i32, i32) {
    %c0_i32 = arith.constant 0 : i32
    %c0_i32_0 = arith.constant 0 : i32
    return %arg0, %c0_i32, %arg1 : i32, i32, i32
  }
  func.func @transform_2(%arg0: i32, %arg1: i32) -> (i32, i32, i32) {
    %c1_i32 = arith.constant 1 : i32
    %0 = arith.muli %arg1, %c1_i32 : i32
    %c1_i32_0 = arith.constant 1 : i32
    %1 = arith.addi %0, %c1_i32_0 : i32
    %c0_i32 = arith.constant 0 : i32
    %2 = arith.minsi %1, %c0_i32 : i32
    %c0_i32_1 = arith.constant 0 : i32
    %c0_i32_2 = arith.constant 0 : i32
    return %arg0, %c0_i32_1, %2 : i32, i32, i32
  }
  func.func @transform_3(%arg0: i32, %arg1: i32) -> (i32, i32) {
    %c0_i32 = arith.constant 0 : i32
    %c0_i32_0 = arith.constant 0 : i32
    %c0_i32_1 = arith.constant 0 : i32
    return %c0_i32, %c0_i32_0 : i32, i32
  }
  func.func @transform_4(%arg0: i32, %arg1: i32) -> (i32, i32) {
    %c0_i32 = arith.constant 0 : i32
    %c0_i32_0 = arith.constant 0 : i32
    %c0_i32_1 = arith.constant 0 : i32
    return %c0_i32, %c0_i32_0 : i32, i32
  }
  func.func @transform_5(%arg0: i32, %arg1: i32) -> (i32, i32) {
    %c0_i32 = arith.constant 0 : i32
    %c0_i32_0 = arith.constant 0 : i32
    %c0_i32_1 = arith.constant 0 : i32
    return %c0_i32, %c0_i32_0 : i32, i32
  }
  func.func @transform_6(%arg0: i32, %arg1: i32) -> (i32, i32) {
    %c0_i32 = arith.constant 0 : i32
    %c0_i32_0 = arith.constant 0 : i32
    %c0_i32_1 = arith.constant 0 : i32
    return %c0_i32, %c0_i32_0 : i32, i32
  }
  func.func @transform_7(%arg0: i32, %arg1: i32) -> (i32, i32) {
    %c0_i32 = arith.constant 0 : i32
    %c0_i32_0 = arith.constant 0 : i32
    %c0_i32_1 = arith.constant 0 : i32
    return %c0_i32, %c0_i32_0 : i32, i32
  }
  func.func @transform_8(%arg0: i32, %arg1: i32) -> (i32, i32) {
    %c0_i32 = arith.constant 0 : i32
    %c0_i32_0 = arith.constant 0 : i32
    %c0_i32_1 = arith.constant 0 : i32
    return %c0_i32, %c0_i32_0 : i32, i32
  }
  func.func @transform_9(%arg0: i32, %arg1: i32) -> (i32, i32, i32) {
    %c0_i32 = arith.constant 0 : i32
    %c0_i32_0 = arith.constant 0 : i32
    return %arg0, %c0_i32, %arg1 : i32, i32, i32
  }
}

module attributes {stable_mosaic.version = 11 : i64} {
  func.func @kernel(%arg0: i32, %arg1: i32, %arg2: memref<1x16x128xbf16, #tpu.memory_space<vmem>>, %arg3: memref<1x16x128xbf16, #tpu.memory_space<vmem>>, %arg4: memref<1x16x128xbf16, #tpu.memory_space<vmem>>, %arg5: memref<16x48xbf16, #tpu.memory_space<vmem>>, %arg6: memref<16x1xf32, #tpu.memory_space<vmem>>, %arg7: memref<16x48xbf16, #tpu.memory_space<vmem>>, %arg8: memref<16x1xf32, #tpu.memory_space<vmem>>, %arg9: memref<1x16x128xbf16, #tpu.memory_space<vmem>>) attributes {dimension_semantics = [#tpu.dimension_semantics<parallel>, #tpu.dimension_semantics<parallel>], iteration_bounds = array<i64: 2, 1>, scalar_prefetch = 0 : i64, scratch_operands = 0 : i64, tpu.core_type = #tpu.core_type<tc>, window_params = [{transform_indices = @transform_0, window_bounds = array<i64: 1, 16, 128>}, {transform_indices = @transform_1, window_bounds = array<i64: 1, 16, 128>}, {transform_indices = @transform_2, window_bounds = array<i64: 1, 16, 128>}, {pipeline_mode = #tpu.pipeline_mode<synchronous>, transform_indices = @transform_3, window_bounds = array<i64: 16, 48>}, {pipeline_mode = #tpu.pipeline_mode<synchronous>, transform_indices = @transform_4, window_bounds = array<i64: 16, 1>}, {pipeline_mode = #tpu.pipeline_mode<synchronous>, transform_indices = @transform_5, window_bounds = array<i64: 16, 48>}, {pipeline_mode = #tpu.pipeline_mode<synchronous>, transform_indices = @transform_6, window_bounds = array<i64: 16, 1>}, {transform_indices = @transform_7, window_bounds = array<i64: 1, 16, 128>}]} {
    %c128_i32 = arith.constant 128 : i32
    %0 = arith.muli %arg1, %c128_i32 : i32
    %c0 = arith.constant 0 : index
    %c0_0 = arith.constant 0 : index
    %c0_1 = arith.constant 0 : index
    %1 = vector.load %arg2[%c0, %c0_0, %c0_1] : memref<1x16x128xbf16, #tpu.memory_space<vmem>>, vector<1x16x128xbf16>
    %2 = vector.shape_cast %1 : vector<1x16x128xbf16> to vector<16x128xbf16>
    %c0_2 = arith.constant 0 : index
    %c0_3 = arith.constant 0 : index
    %c0_4 = arith.constant 0 : index
    %3 = vector.load %arg3[%c0_2, %c0_3, %c0_4] : memref<1x16x128xbf16, #tpu.memory_space<vmem>>, vector<1x16x128xbf16>
    %4 = vector.shape_cast %3 : vector<1x16x128xbf16> to vector<16x128xbf16>
    %c0_5 = arith.constant 0 : index
    %c0_6 = arith.constant 0 : index
    %c0_7 = arith.constant 0 : index
    %5 = vector.load %arg4[%c0_5, %c0_6, %c0_7] : memref<1x16x128xbf16, #tpu.memory_space<vmem>>, vector<1x16x128xbf16>
    %6 = vector.shape_cast %5 : vector<1x16x128xbf16> to vector<16x128xbf16>
    %7 = tpu.concatenate %2, %4, %6 in 1 : vector<16x128xbf16>, vector<16x128xbf16>, vector<16x128xbf16> -> vector<16x384xbf16>
    %c128_i32_8 = arith.constant 128 : i32
    %8 = arith.subi %0, %c128_i32_8 : i32
    %9 = tpu.iota {dimensions = array<i32: 1>} : vector<1x384xi32>
    %10 = vector.broadcast %8 : i32 to vector<1x384xi32>
    %11 = arith.addi %10, %9 : vector<1x384xi32>
    %c0_i32 = arith.constant 0 : i32
    %12 = vector.broadcast %c0_i32 : i32 to vector<1x384xi32>
    %13 = arith.cmpi sge, %11, %12 : vector<1x384xi32>
    %c16_i32 = arith.constant 16 : i32
    %14 = vector.broadcast %c16_i32 : i32 to vector<1x384xi32>
    %15 = arith.cmpi slt, %11, %14 : vector<1x384xi32>
    %16 = arith.andi %13, %15 : vector<1x384xi1>
    %cst = arith.constant 0.000000e+00 : bf16
    %17 = vector.broadcast %cst : bf16 to vector<16x384xbf16>
    %18 = vector.shape_cast %16 : vector<1x384xi1> to vector<1x384xi1>
    %19 = vector.broadcast %18 : vector<1x384xi1> to vector<16x384xi1>
    %20 = arith.select %19, %7, %17 : vector<16x384xi1>, vector<16x384xbf16>
    %21 = vector.extract_strided_slice %20 {offsets = [0, 124], sizes = [16, 256], strides = [1, 1]} : vector<16x384xbf16> to vector<16x256xbf16>
    %22 = vector.extract_strided_slice %20 {offsets = [0, 126], sizes = [16, 256], strides = [1, 1]} : vector<16x384xbf16> to vector<16x256xbf16>
    %23 = vector.extract_strided_slice %20 {offsets = [0, 128], sizes = [16, 256], strides = [1, 1]} : vector<16x384xbf16> to vector<16x256xbf16>
    %24 = tpu.concatenate %21, %22, %23 in 0 : vector<16x256xbf16>, vector<16x256xbf16>, vector<16x256xbf16> -> vector<48x256xbf16>
    %c0_9 = arith.constant 0 : index
    %c0_10 = arith.constant 0 : index
    %25 = vector.load %arg5[%c0_9, %c0_10] : memref<16x48xbf16, #tpu.memory_space<vmem>>, vector<16x48xbf16>
    %cst_11 = arith.constant dense<0.000000e+00> : vector<16x256xf32>
    %26 = tpu.matmul %25, %24, %cst_11 {dimension_numbers = #tpu.dot_dimension_numbers<[1], [0], [0], [1], [0, 0, 1, 1], [], []>} : vector<16x48xbf16>, vector<48x256xbf16>, vector<16x256xf32> -> vector<16x256xf32>
    %c0_12 = arith.constant 0 : index
    %c0_13 = arith.constant 0 : index
    %27 = vector.load %arg6[%c0_12, %c0_13] : memref<16x1xf32, #tpu.memory_space<vmem>>, vector<16x1xf32>
    %28 = vector.broadcast %27 : vector<16x1xf32> to vector<16x256xf32>
    %29 = arith.addf %26, %28 : vector<16x256xf32>
    %c2_i32 = arith.constant 2 : i32
    %30 = arith.subi %0, %c2_i32 : i32
    %31 = tpu.iota {dimensions = array<i32: 1>} : vector<1x256xi32>
    %32 = vector.broadcast %30 : i32 to vector<1x256xi32>
    %33 = arith.addi %32, %31 : vector<1x256xi32>
    %cst_14 = arith.constant 0.000000e+00 : f32
    %34 = vector.broadcast %cst_14 : f32 to vector<16x256xf32>
    %35 = arith.cmpf ogt, %29, %34 : vector<16x256xf32>
    %c0_i32_15 = arith.constant 0 : i32
    %36 = vector.broadcast %c0_i32_15 : i32 to vector<1x256xi32>
    %37 = arith.cmpi sge, %33, %36 : vector<1x256xi32>
    %38 = vector.broadcast %37 : vector<1x256xi1> to vector<16x256xi1>
    %39 = arith.andi %35, %38 : vector<16x256xi1>
    %c16_i32_16 = arith.constant 16 : i32
    %40 = vector.broadcast %c16_i32_16 : i32 to vector<1x256xi32>
    %41 = arith.cmpi slt, %33, %40 : vector<1x256xi32>
    %42 = vector.broadcast %41 : vector<1x256xi1> to vector<16x256xi1>
    %43 = arith.andi %39, %42 : vector<16x256xi1>
    %cst_17 = arith.constant 0.000000e+00 : f32
    %44 = vector.broadcast %cst_17 : f32 to vector<16x256xf32>
    %45 = arith.select %43, %29, %44 : vector<16x256xi1>, vector<16x256xf32>
    %46 = arith.truncf %45 : vector<16x256xf32> to vector<16x256xbf16>
    %47 = vector.extract_strided_slice %46 {offsets = [0, 0], sizes = [16, 128], strides = [1, 1]} : vector<16x256xbf16> to vector<16x128xbf16>
    %48 = vector.extract_strided_slice %46 {offsets = [0, 2], sizes = [16, 128], strides = [1, 1]} : vector<16x256xbf16> to vector<16x128xbf16>
    %49 = vector.extract_strided_slice %46 {offsets = [0, 4], sizes = [16, 128], strides = [1, 1]} : vector<16x256xbf16> to vector<16x128xbf16>
    %50 = tpu.concatenate %47, %48, %49 in 0 : vector<16x128xbf16>, vector<16x128xbf16>, vector<16x128xbf16> -> vector<48x128xbf16>
    %c0_18 = arith.constant 0 : index
    %c0_19 = arith.constant 0 : index
    %51 = vector.load %arg7[%c0_18, %c0_19] : memref<16x48xbf16, #tpu.memory_space<vmem>>, vector<16x48xbf16>
    %cst_20 = arith.constant dense<0.000000e+00> : vector<16x128xf32>
    %52 = tpu.matmul %51, %50, %cst_20 {dimension_numbers = #tpu.dot_dimension_numbers<[1], [0], [0], [1], [0, 0, 1, 1], [], []>} : vector<16x48xbf16>, vector<48x128xbf16>, vector<16x128xf32> -> vector<16x128xf32>
    %c0_21 = arith.constant 0 : index
    %c0_22 = arith.constant 0 : index
    %53 = vector.load %arg8[%c0_21, %c0_22] : memref<16x1xf32, #tpu.memory_space<vmem>>, vector<16x1xf32>
    %54 = vector.broadcast %53 : vector<16x1xf32> to vector<16x128xf32>
    %55 = arith.addf %52, %54 : vector<16x128xf32>
    %cst_23 = arith.constant 0.000000e+00 : f32
    %56 = vector.broadcast %cst_23 : f32 to vector<16x128xf32>
    %57 = arith.maximumf %55, %56 : vector<16x128xf32>
    %58 = vector.extract_strided_slice %20 {offsets = [0, 128], sizes = [16, 128], strides = [1, 1]} : vector<16x384xbf16> to vector<16x128xbf16>
    %59 = arith.extf %58 : vector<16x128xbf16> to vector<16x128xf32>
    %60 = arith.addf %57, %59 : vector<16x128xf32>
    %cst_24 = arith.constant 0.000000e+00 : f32
    %61 = vector.broadcast %cst_24 : f32 to vector<16x128xf32>
    %62 = arith.maximumf %60, %61 : vector<16x128xf32>
    %63 = arith.truncf %62 : vector<16x128xf32> to vector<16x128xbf16>
    %c0_25 = arith.constant 0 : index
    %c0_26 = arith.constant 0 : index
    %c0_27 = arith.constant 0 : index
    %64 = vector.load %arg9[%c0_25, %c0_26, %c0_27] : memref<1x16x128xbf16, #tpu.memory_space<vmem>>, vector<1x16x128xbf16>
    %65 = vector.shape_cast %64 : vector<1x16x128xbf16> to vector<16x128xbf16>
    %66 = vector.shape_cast %63 : vector<16x128xbf16> to vector<1x16x128xbf16>
    tpu.vector_store %arg9[%c0_25, %c0_26, %c0_27], %66 {strides = array<i32>} : memref<1x16x128xbf16, #tpu.memory_space<vmem>>, vector<1x16x128xbf16>,
    return
  }
  func.func @transform_0(%arg0: i32, %arg1: i32) -> (i32, i32, i32) {
    %c1_i32 = arith.constant 1 : i32
    %0 = arith.muli %arg1, %c1_i32 : i32
    %c1_i32_0 = arith.constant 1 : i32
    %1 = arith.subi %0, %c1_i32_0 : i32
    %c0_i32 = arith.constant 0 : i32
    %2 = arith.maxsi %1, %c0_i32 : i32
    %c0_i32_1 = arith.constant 0 : i32
    %c0_i32_2 = arith.constant 0 : i32
    return %arg0, %c0_i32_1, %2 : i32, i32, i32
  }
  func.func @transform_1(%arg0: i32, %arg1: i32) -> (i32, i32, i32) {
    %c0_i32 = arith.constant 0 : i32
    %c0_i32_0 = arith.constant 0 : i32
    return %arg0, %c0_i32, %arg1 : i32, i32, i32
  }
  func.func @transform_2(%arg0: i32, %arg1: i32) -> (i32, i32, i32) {
    %c1_i32 = arith.constant 1 : i32
    %0 = arith.muli %arg1, %c1_i32 : i32
    %c1_i32_0 = arith.constant 1 : i32
    %1 = arith.addi %0, %c1_i32_0 : i32
    %c0_i32 = arith.constant 0 : i32
    %2 = arith.minsi %1, %c0_i32 : i32
    %c0_i32_1 = arith.constant 0 : i32
    %c0_i32_2 = arith.constant 0 : i32
    return %arg0, %c0_i32_1, %2 : i32, i32, i32
  }
  func.func @transform_3(%arg0: i32, %arg1: i32) -> (i32, i32) {
    %c0_i32 = arith.constant 0 : i32
    %c0_i32_0 = arith.constant 0 : i32
    %c0_i32_1 = arith.constant 0 : i32
    return %c0_i32, %c0_i32_0 : i32, i32
  }
  func.func @transform_4(%arg0: i32, %arg1: i32) -> (i32, i32) {
    %c0_i32 = arith.constant 0 : i32
    %c0_i32_0 = arith.constant 0 : i32
    %c0_i32_1 = arith.constant 0 : i32
    return %c0_i32, %c0_i32_0 : i32, i32
  }
  func.func @transform_5(%arg0: i32, %arg1: i32) -> (i32, i32) {
    %c0_i32 = arith.constant 0 : i32
    %c0_i32_0 = arith.constant 0 : i32
    %c0_i32_1 = arith.constant 0 : i32
    return %c0_i32, %c0_i32_0 : i32, i32
  }
  func.func @transform_6(%arg0: i32, %arg1: i32) -> (i32, i32) {
    %c0_i32 = arith.constant 0 : i32
    %c0_i32_0 = arith.constant 0 : i32
    %c0_i32_1 = arith.constant 0 : i32
    return %c0_i32, %c0_i32_0 : i32, i32
  }
  func.func @transform_7(%arg0: i32, %arg1: i32) -> (i32, i32, i32) {
    %c0_i32 = arith.constant 0 : i32
    %c0_i32_0 = arith.constant 0 : i32
    return %arg0, %c0_i32, %arg1 : i32, i32, i32
  }
}

</mosaic_0001>

<bundles_post_ra>
// kernel: temporal_conv_net_forward.3
= control target key start
LH: loop header
LB: loop body
LE: loop exit
PB: predicated region body
PF: predicated region fallthrough
CT: control target
= control target key end

     0   :  { %s972_s24 = smov 0   ;;  %s974_s25 = smov 0   ;;  %s1090_s0 = inlined_call_operand.vmem [shape: bf16[2,16,128], index: 0, kind: input, shape index: {}, may-alias: {0,1,2}]   ;;  %s1091_s1 = inlined_call_operand.vmem [shape: bf16[2,16,128], index: 1, kind: input, shape index: {}, may-alias: {0,1,2}]   ;;  %s1092_s2 = inlined_call_operand.vmem [shape: bf16[2,16,128], index: 2, kind: input, shape index: {}, may-alias: {0,1,2}]   ;;  %s1093_s3 = inlined_call_operand.vmem [shape: bf16[16,48], index: 3, kind: input, shape index: {}]   ;;  %s1094_s4 = inlined_call_operand.vmem [shape: f32[16,1], index: 4, kind: input, shape index: {}]   ;;  %s1095_s5 = inlined_call_operand.vmem [shape: bf16[16,48], index: 5, kind: input, shape index: {}]   ;;  %s1096_s6 = inlined_call_operand.vmem [shape: f32[16,1], index: 6, kind: input, shape index: {}]   ;;  %s1097_s7 = inlined_call_operand.vmem [shape: bf16[2,16,128], index: 7, kind: output, shape index: {}]  }
   0x1   :  { %s976_s26 = smov 0  }
   0x2 LB: > { %s29_s27 = sadd.s32 1, %s921_s25  ;;  %p823_p0 = scmp.ge.s32.totalorder %s925_s26, 1  ;;  %s925_s26 = sphi %s976_s26, %s17_s26   ;;  %s921_s25 = sphi %s974_s25, %s1099_s25   ;;  %s917_s24 = sphi %s972_s24, %s1098_s24  }
   0x3   : > { %p31_p1 = scmp.ge.s32.totalorder %s29_s27, 2  ;;  %p310_p2 = scmp.lt.s32.totalorder %s925_s26, 3 }
   0x5   : > { %s1101_s27 = smov (%p31_p1, %s29_s27), 0  ;;  %p311_p3 = pnand %p823_p0, %p310_p2 }
   0x6   : > { %p373_p4 = scmp.lt.s32.totalorder (!%p311_p3), %s917_s24, 1  ;;  %s929_s12 = smov (!%p311_p3), 126  }
   0x7   : > { %314 = sbr.rel (%p311_p3) target bundleno = 710 (0x2c6), region = 48  ;;  %s930_s16 = smov (!%p311_p3), 124  }
   0x8   : > { %s931_s17 = smov (!%p311_p3), 4  }
   0xc   : > { %v443_v0 = vlaneseq  ;;  %vm927_vm0 = vmmov 0   ;;  %v928_v1 = vmov 0   ;;  %s1103_s24 = smov (!%p373_p4, %s917_s24), 1  ;;  %vm513_vm13 = vcmask 1014784   ;;  %v518_v32 = vld [vmem:[%s1094_s4 + $0x8] sm:$0xff]  ;;  %v654_v34 = vld [vmem:[%s1096_s6] sm:$0xff] }
   0xd   : > { %vm467_vm1 = vmpackc.low %vm927_vm0, %vm927_vm0  ;;  %901 = vset.pattern.permute.xlu0 %v928_v1  ;;  %900 = vset.pattern.permute.xlu2 %v928_v1  ;;  %s995_s28 = sshll.u32 %s1103_s24, 3  ;;  %v475_v6 = vunpack.c.l.b16 %v928_v1  ;;  %v476_v7 = vunpack.c.h.b16 %v928_v1  ;;  %vm506_vm14 = vcmask 1031168   ;;  %v517_v35 = vld [vmem:[%s1094_s4] sm:$0xff]  ;;  %vm552_vm15 = vcmask 31744  }
   0xe   : > { %v992_v2 = vand.u32 127, %v443_v0  ;;  %v469_v3 = vsel %vm467_vm1, 65537, %v928_v1  ;;  %902 = vset.pattern.permute.xlu1 %v928_v1  ;;  %s402_s8 = scalar_lea.vmem %s1092_s2, %s995_s28  ;;  %s391_s11 = scalar_lea.vmem %s1091_s1, %s995_s28  ;;  %v864_v44 = vld [vmem:[%s1093_s3] sm:$0xff]  ;;  %v655_v0 = vld [vmem:[%s1096_s6 + $0x8] sm:$0xff] }
   0xf   : > { %v472_v4 = vperm.slane %v469_v3, 0  ;;  %v863_v11 = vld [vmem:[%s402_s8] sm:$0xff]  ;;  %s380_s15 = scalar_lea.vmem %s1090_s0, %s995_s28  ;;  %s413_s13 = scalar_lea.vmem %s1097_s7, %s995_s28 }
  0x10   : > { %v445_v5 = vadd.s32 128, %v992_v2  ;;  %v862_v16 = vld [vmem:[%s391_s11] sm:$0xff]  ;;  %v599_v48 = vadd.s32 4294967294, %v992_v2 }
  0x11   : > { %v487_v8 = vunpack.c.l.b16 %v472_v4  ;;  %v488_v9 = vunpack.c.h.b16 %v472_v4  ;;  %v861_v21 = vld [vmem:[%s380_s15] sm:$0xff] }
  0x12   : > { %v449_v10 = vadd.s32 4294967168, %v445_v5  ;;  %vm605_vm1 = vcmp.ge.s32.totalorder %v599_v48, 0 }
  0x13   : > { %vm491_vm2 = vcmp.ne.s32.totalorder %v487_v8, %v475_v6  ;;  %vm492_vm3 = vcmp.ne.s32.totalorder %v488_v9, %v476_v7 }
  0x14   : > { %vm455_vm4 = vcmp.lt.s32.totalorder %v449_v10, 16  ;;  %vm493_vm5 = vmpackc.low %vm492_vm3, %vm491_vm2 }
  0x15   : > { %vm466_vm6 = vmpackc.low %vm455_vm4, %vm927_vm0  ;;  %v1002_v12 = vsel %vm493_vm5, %v863_v11, 0  ;;  %vm565_vm0 = vcmask 392192   ;;  %vm615_vm4 = vcmp.lt.s32.totalorder %v599_v48, 16 }
  0x16   : > { %v468_v13 = vsel %vm466_vm6, 65537, %v928_v1  ;;  %504 = vrot.lane.b32.xlu2 %v1002_v12, %s929_s12 }
  0x17   : > { %v471_v14 = vperm.slane %v468_v13, 4  ;;  %v470_v15 = vperm.slane %v468_v13, 0 }
  0x19   : > { %v480_v17 = vunpack.c.l.b16 %v471_v14  ;;  %v481_v18 = vunpack.c.h.b16 %v471_v14  ;;  %v473_v19 = vunpack.c.l.b16 %v470_v15  ;;  %v474_v20 = vunpack.c.h.b16 %v470_v15 }
  0x1b   : > { %vm484_vm7 = vcmp.ne.s32.totalorder %v480_v17, %v475_v6  ;;  %vm485_vm8 = vcmp.ne.s32.totalorder %v481_v18, %v476_v7  ;;  %vm477_vm9 = vcmp.ne.s32.totalorder %v473_v19, %v475_v6  ;;  %vm478_vm10 = vcmp.ne.s32.totalorder %v474_v20, %v476_v7  ;;  %v865_v7 = vld [vmem:[%s1095_s5] sm:$0xff] }
  0x1c   : > { %vm486_vm11 = vmpackc.low %vm485_vm8, %vm484_vm7 }
  0x1d   : > { %v1014_v22 = vsel %vm486_vm11, %v862_v16, 0  ;;  %vm479_vm12 = vmpackc.low %vm478_vm10, %vm477_vm9 }
  0x1e   : > { %509 = vrot.lane.b32.xlu0 %v1014_v22, %s930_s16  ;;  %v494_v23 = vsel %vm479_vm12, %v861_v21, 0  ;;  %v690_v18 = vunpack.c.l.bf16 %v1014_v22  ;;  %v691_v20 = vunpack.c.h.bf16 %v1014_v22 }
  0x1f   : > { %500 = vrot.lane.b32.xlu1 %v494_v23, %s929_s12 }
  0x26   : > { %511 = vrot.lane.b32.xlu0 %v1002_v12, %s930_s16 }
  0x27   : > { %502 = vrot.lane.b32.xlu1 %v1014_v22, %s929_s12 }
  0x70   : > { %v1024_v26 = vpop.permute.xlu2 %504 }
  0x90   : > { %v510_v24 = vpop.permute.xlu0 %509 }
  0x91   : > { %v501_v25 = vpop.permute.xlu1 %500  ;;  %546 = vrot.lane.b32.xlu2 %v510_v24, %s931_s17 }
  0x98   : > { %v512_v27 = vpop.permute.xlu0 %511 }
  0x99   : > { %v503_v28 = vpop.permute.xlu1 %502  ;;  %v514_v29 = vsel %vm513_vm13, %v510_v24, %v512_v27 }
  0x9a   : > { %548 = vrot.lane.b32.xlu0 %v514_v29, %s931_s17  ;;  %v508_v30 = vsel %vm506_vm14, %v503_v28, %v1024_v26  ;;  %v507_v31 = vsel %vm506_vm14, %v501_v25, %v503_v28 }
  0x9b   : > { %542 = vrot.lane.b32.xlu2 %v508_v30, %s931_s17  ;;  %540 = vrot.lane.b32.xlu1 %v507_v31, %s931_s17 }
  0xa2   : > { %534 = vrot.lane.b32.xlu0 %v494_v23, %s931_s17 }
  0xa3   : > { %536 = vrot.lane.b32.xlu1 %v1014_v22, %s931_s17  ;;  %521 = vperm.xlu2 %900, %v517_v35  }
  0xaa   : > { %526 = vperm.xlu0 %901, %v518_v32  }
  0xb2   : > { %550 = vrot.lane.b32.xlu0 %v512_v27, %s931_s17 }
  0xba   : > { %658 = vperm.xlu0 %901, %v654_v34  }
  0xeb   : > { %v547_v33 = vpop.permute.xlu2 %546 }
  0xf5   : > { %v543_v39 = vpop.permute.xlu2 %542 }
  0xfd   : > { %v522_v49 = vpop.permute.xlu2 %521 }
 0x10c   : > { %v549_v36 = vpop.permute.xlu0 %548 }
 0x10d   : > { %v541_v37 = vpop.permute.xlu1 %540  ;;  %v557_v38 = vsel %vm552_vm15, %v547_v33, %v549_v36 }
 0x10e   : > { %574 = vmatpush.bf16.msra.mxu0 %v557_v38  ;;  %v555_v40 = vsel %vm552_vm15, %v541_v37, %v543_v39 }
 0x112   : > { %575 = vmatpush.bf16.msra.mxu0 %v555_v40 }
 0x114   : > { %v535_v41 = vpop.permute.xlu0 %534 }
 0x115   : > { %v537_v42 = vpop.permute.xlu1 %536 }
 0x116   : > { %v553_v43 = vsel %vm552_vm15, %v535_v41, %v537_v42 }
 0x117   : > { %576 = vmatpush.bf16.msra.mxu0 %v553_v43 }
 0x11a   : > { %848 = vmatmul.msk.bf16.vlgmr.msra.gmra.mxu0 %vm565_vm0, %v864_v44 }
 0x11c   : > { %v527_v45 = vpop.permute.xlu0 %526 }
 0x124   : > { %v551_v46 = vpop.permute.xlu0 %550 }
 0x125   : > { %v558_v47 = vsel %vm552_vm15, %v549_v36, %v551_v46 }
 0x126   : > { %588 = vmatpush.bf16.msra.mxu1 %v558_v47 }
 0x12c   : > { %v659_v13 = vpop.permute.xlu0 %658 }
 0x197   : > { %v578_v50 = vpop.f32.mrf.mxu0 }
 0x198   : > { %v579_v51 = vadd.f32 %v578_v50, %v522_v49 }
 0x19a   : > { %vm601_vm2 = vcmp.gt.f32.partialorder %v579_v51, 0.0 }
 0x19b   : > { %vm611_vm3 = vmand %vm601_vm2, %vm605_vm1 }
 0x19c   : > { %vm621_vm5 = vmand %vm611_vm3, %vm615_vm4 }
 0x19d   : > { %v625_v54 = vsel %vm621_vm5, %v579_v51, 0.0 }
 0x19e   : > { %v629_v55 = vpack.c.bf16 0.0, %v625_v54 }
 0x19f   : > { %v580_v52 = vpop.f32.mrf.mxu0 }
 0x1a0   : > { %v581_v53 = vadd.f32 %v580_v52, %v527_v45  ;;  %v633_v58 = vunpack.c.l.b16 %v629_v55  ;;  %v637_v59 = vunpack.c.h.b16 %v629_v55 }
 0x1a2   : > { %vm603_vm6 = vcmp.gt.f32.partialorder %v581_v53, 0.0 }
 0x1a3   : > { %vm613_vm7 = vmand %vm603_vm6, %vm605_vm1 }
 0x1a4   : > { %vm623_vm8 = vmand %vm613_vm7, %vm615_vm4 }
 0x1a5   : > { %v627_v56 = vsel %vm623_vm8, %v581_v53, 0.0 }
 0x1a6   : > { %v630_v57 = vpack.c.bf16 0.0, %v627_v56 }
 0x1a8   : > { %v634_v60 = vunpack.c.l.b16 %v630_v57  ;;  %v638_v61 = vunpack.c.h.b16 %v630_v57 }
 0x1aa   : > { %v639_v62 = vpack.c.b16 %v638_v61, %v637_v59  ;;  %v635_v63 = vpack.c.b16 %v634_v60, %v633_v58 }
 0x1ac   : > { %648 = vrot.lane.b32.xlu2 %v639_v62, %s930_s16  ;;  %646 = vrot.lane.b32.xlu1 %v635_v63, %s930_s16 }
 0x1b4   : > { %642 = vrot.lane.b32.xlu2 %v639_v62, %s929_s12  ;;  %640 = vrot.lane.b32.xlu1 %v635_v63, %s929_s12 }
 0x1bc   : > { %538 = vrot.lane.b32.xlu2 %v1002_v12, %s931_s17  ;;  %544 = vrot.lane.b32.xlu1 %v1024_v26, %s931_s17 }
 0x1c4   : > { %663 = vperm.xlu1 %902, %v655_v0  }
 0x206   : > { %v649_v1 = vpop.permute.xlu2 %648 }
 0x20e   : > { %v643_v4 = vpop.permute.xlu2 %642 }
 0x216   : > { %v539_v10 = vpop.permute.xlu2 %538 }
 0x217   : > { %v554_v11 = vsel %vm552_vm15, %v537_v42, %v539_v10 }
 0x21e   : > { %v647_v2 = vpop.permute.xlu1 %646 }
 0x21f   : > { %v650_v3 = vsel %vm513_vm13, %v647_v2, %v649_v1 }
 0x220   : > { %679 = vmatpush.bf16.msra.mxu2 %v650_v3 }
 0x226   : > { %v641_v5 = vpop.permute.xlu1 %640 }
 0x227   : > { %v644_v6 = vsel %vm506_vm14, %v641_v5, %v643_v4 }
 0x228   : > { %680 = vmatpush.bf16.msra.mxu2 %v644_v6 }
 0x22c   : > { %681 = vmatpush.bf16.msra.mxu2 %v635_v63 }
 0x22e   : > { %v545_v8 = vpop.permute.xlu1 %544 }
 0x22f   : > { %854 = vmatmul.msk.bf16.vlgmr.msra.gmra.mxu2 %vm565_vm0, %v865_v7  ;;  %v556_v9 = vsel %vm552_vm15, %v543_v39, %v545_v8 }
 0x230   : > { %589 = vmatpush.bf16.msra.mxu1 %v556_v9 }
 0x234   : > { %590 = vmatpush.bf16.msra.mxu1 %v554_v11 }
 0x236   : > { %v664_v16 = vpop.permute.xlu1 %663 }
 0x237   : > { %849 = vmatmul.msk.bf16.vlgmr.msra.gmra.mxu1 %vm565_vm0, %v864_v44 }
 0x2b2   : > { %v683_v12 = vpop.f32.mrf.mxu2 }
 0x2b3   : > { %v684_v15 = vadd.f32 %v683_v12, %v659_v13 }
 0x2b4   : > { %v592_v14 = vpop.f32.mrf.mxu1 }
 0x2b5   : > { %v688_v17 = vmax.f32 %v684_v15, 0.0 }
 0x2b7   : > { %v692_v24 = vadd.f32 %v690_v18, %v688_v17 }
 0x2b9   : > { %v694_v27 = vmax.f32 %v692_v24, 0.0 }
 0x2ba   : > { %v685_v19 = vpop.f32.mrf.mxu2 }
 0x2bb   : > { %v686_v21 = vadd.f32 %v685_v19, %v664_v16 }
 0x2bc   : > { %v594_v23 = vpop.f32.mrf.mxu1 }
 0x2bd   : > { %v689_v25 = vmax.f32 %v686_v21, 0.0 }
 0x2bf   : > { %v693_v26 = vadd.f32 %v691_v20, %v689_v25 }
 0x2c1   : > { %v695_v28 = vmax.f32 %v693_v26, 0.0 }
 0x2c3   : > { %v869_v29 = vpack.c.bf16 %v695_v28, %v694_v27 }
 0x2c5   : > { %870 = vst [vmem:[%s413_s13] sm:$0xff] %v869_v29  }
 0x2c6 PF: > { %s17_s26 = sadd.s32 1, %s925_s26   ;;  %s1098_s24 = smov %s921_s25 }
 0x2c7   : > { %p14_p5 = scmp.ge.s32.totalorder %s17_s26, 4   ;;  %s1099_s25 = smov %s1101_s27 }
 0x2c9   :  { %16 = sbr.rel (!%p14_p5) target bundleno = 2 (0x2), region = 84 }

// kernel: temporal_conv_net_forward.2
= control target key start
LH: loop header
LB: loop body
LE: loop exit
PB: predicated region body
PF: predicated region fallthrough
CT: control target
= control target key end

     0   :  { %s1077_s30 = smov 0   ;;  %s1079_s10 = smov 0   ;;  %s1197_s0 = inlined_call_operand.vmem [shape: bf16[2,16,128], index: 0, kind: input, shape index: {}, may-alias: {0,1,2}]   ;;  %s1198_s1 = inlined_call_operand.vmem [shape: bf16[2,16,128], index: 1, kind: input, shape index: {}, may-alias: {0,1,2}]   ;;  %s1199_s2 = inlined_call_operand.vmem [shape: bf16[2,16,128], index: 2, kind: input, shape index: {}, may-alias: {0,1,2}]   ;;  %s1200_s3 = inlined_call_operand.vmem [shape: bf16[16,48], index: 3, kind: input, shape index: {}]   ;;  %s1201_s4 = inlined_call_operand.vmem [shape: f32[16,1], index: 4, kind: input, shape index: {}]   ;;  %s1202_s5 = inlined_call_operand.vmem [shape: bf16[16,48], index: 5, kind: input, shape index: {}]   ;;  %s1203_s6 = inlined_call_operand.vmem [shape: f32[16,1], index: 6, kind: input, shape index: {}]   ;;  %s1204_s7 = inlined_call_operand.vmem [shape: bf16[16,16], index: 7, kind: input, shape index: {}]   ;;  %s1205_s8 = inlined_call_operand.vmem [shape: f32[16,1], index: 8, kind: input, shape index: {}]   ;;  %s1206_s9 = inlined_call_operand.vmem [shape: bf16[2,16,128], index: 9, kind: output, shape index: {}]  }
   0x1   :  { %s1081_s11 = smov 0  }
   0x2 LB: > { %s31_s12 = sadd.s32 1, %s1016_s10  ;;  %p912_p0 = scmp.ge.s32.totalorder %s1020_s11, 1  ;;  %s1020_s11 = sphi %s1081_s11, %s19_s11   ;;  %s1016_s10 = sphi %s1079_s10, %s1208_s10   ;;  %s1012_s30 = sphi %s1077_s30, %s1207_s30  }
   0x3   : > { %p33_p1 = scmp.ge.s32.totalorder %s31_s12, 2  ;;  %p360_p2 = scmp.lt.s32.totalorder %s1020_s11, 3 }
   0x5   : > { %s1210_s12 = smov (%p33_p1, %s31_s12), 0  ;;  %p361_p3 = pnand %p912_p0, %p360_p2 }
   0x6   : > { %p427_p4 = scmp.lt.s32.totalorder (!%p361_p3), %s1012_s30, 1  ;;  %s1024_s20 = smov (!%p361_p3), 127  }
   0x7   : > { %364 = sbr.rel (%p361_p3) target bundleno = 710 (0x2c6), region = 56  ;;  %s1025_s24 = smov (!%p361_p3), 126  }
   0x8   : > { %s1026_s25 = smov (!%p361_p3), 2  }
   0xc   : > { %v497_v0 = vlaneseq  ;;  %vm1022_vm0 = vmmov 0   ;;  %v1023_v1 = vmov 0   ;;  %s1212_s30 = smov (!%p427_p4, %s1012_s30), 1  ;;  %vm567_vm13 = vcmask 1031168   ;;  %v572_v32 = vld [vmem:[%s1201_s4 + $0x8] sm:$0xff]  ;;  %v960_v33 = vld [vmem:[%s1204_s7] sm:$0xff] }
   0xd   : > { %vm521_vm1 = vmpackc.low %vm1022_vm0, %vm1022_vm0  ;;  %996 = vset.pattern.permute.xlu0 %v1023_v1  ;;  %995 = vset.pattern.permute.xlu2 %v1023_v1  ;;  %s1100_s13 = sshll.u32 %s1212_s30, 3  ;;  %v529_v6 = vunpack.c.l.b16 %v1023_v1  ;;  %v530_v7 = vunpack.c.h.b16 %v1023_v1  ;;  %vm560_vm14 = vcmask 1039360   ;;  %vm763_vm15 = vcmask 130048   ;;  %v708_v34 = vld [vmem:[%s1203_s6] sm:$0xff]  ;;  %v747_v36 = vld [vmem:[%s1205_s8 + $0x8] sm:$0xff] }
   0xe   : > { %v1097_v2 = vand.u32 127, %v497_v0  ;;  %v523_v3 = vsel %vm521_vm1, 65537, %v1023_v1  ;;  %997 = vset.pattern.permute.xlu1 %v1023_v1  ;;  %s456_s16 = scalar_lea.vmem %s1199_s2, %s1100_s13  ;;  %s445_s19 = scalar_lea.vmem %s1198_s1, %s1100_s13  ;;  %v571_v37 = vld [vmem:[%s1201_s4] sm:$0xff]  ;;  %vm619_vm1 = vcmask 392192  }
   0xf   : > { %v526_v4 = vperm.slane %v523_v3, 0  ;;  %v957_v11 = vld [vmem:[%s456_s16] sm:$0xff]  ;;  %s434_s23 = scalar_lea.vmem %s1197_s0, %s1100_s13  ;;  %v709_v3 = vld [vmem:[%s1203_s6 + $0x8] sm:$0xff]  ;;  %s467_s29 = scalar_lea.vmem %s1206_s9, %s1100_s13 }
  0x10   : > { %v499_v5 = vadd.s32 128, %v1097_v2  ;;  %v956_v16 = vld [vmem:[%s445_s19] sm:$0xff]  ;;  %v653_v50 = vadd.s32 4294967295, %v1097_v2 }
  0x11   : > { %v541_v8 = vunpack.c.l.b16 %v526_v4  ;;  %v542_v9 = vunpack.c.h.b16 %v526_v4  ;;  %v955_v21 = vld [vmem:[%s434_s23] sm:$0xff] }
  0x12   : > { %v503_v10 = vadd.s32 4294967168, %v499_v5  ;;  %v958_v46 = vld [vmem:[%s1200_s3] sm:$0xff] }
  0x13   : > { %vm545_vm2 = vcmp.ne.s32.totalorder %v541_v8, %v529_v6  ;;  %vm546_vm3 = vcmp.ne.s32.totalorder %v542_v9, %v530_v7  ;;  %v746_v2 = vld [vmem:[%s1205_s8] sm:$0xff] }
  0x14   : > { %vm509_vm4 = vcmp.lt.s32.totalorder %v503_v10, 16  ;;  %vm547_vm5 = vmpackc.low %vm546_vm3, %vm545_vm2  ;;  %vm659_vm2 = vcmp.ge.s32.totalorder %v653_v50, 0  ;;  %v959_v10 = vld [vmem:[%s1202_s5] sm:$0xff] }
  0x15   : > { %vm520_vm6 = vmpackc.low %vm509_vm4, %vm1022_vm0  ;;  %v1107_v12 = vsel %vm547_vm5, %v957_v11, 0  ;;  %vm606_vm0 = vcmask 15360   ;;  %vm669_vm5 = vcmp.lt.s32.totalorder %v653_v50, 16 }
  0x16   : > { %v522_v13 = vsel %vm520_vm6, 65537, %v1023_v1  ;;  %558 = vrot.lane.b32.xlu2 %v1107_v12, %s1024_s20 }
  0x17   : > { %v525_v14 = vperm.slane %v522_v13, 4  ;;  %v524_v15 = vperm.slane %v522_v13, 0 }
  0x19   : > { %v534_v17 = vunpack.c.l.b16 %v525_v14  ;;  %v535_v18 = vunpack.c.h.b16 %v525_v14  ;;  %v527_v19 = vunpack.c.l.b16 %v524_v15  ;;  %v528_v20 = vunpack.c.h.b16 %v524_v15 }
  0x1b   : > { %vm538_vm7 = vcmp.ne.s32.totalorder %v534_v17, %v529_v6  ;;  %vm539_vm8 = vcmp.ne.s32.totalorder %v535_v18, %v530_v7  ;;  %vm531_vm9 = vcmp.ne.s32.totalorder %v527_v19, %v529_v6  ;;  %vm532_vm10 = vcmp.ne.s32.totalorder %v528_v20, %v530_v7 }
  0x1c   : > { %vm540_vm11 = vmpackc.low %vm539_vm8, %vm538_vm7 }
  0x1d   : > { %v549_v22 = vsel %vm540_vm11, %v956_v16, 0  ;;  %vm533_vm12 = vmpackc.low %vm532_vm10, %vm531_vm9 }
  0x1e   : > { %563 = vrot.lane.b32.xlu0 %v549_v22, %s1025_s24  ;;  %v548_v23 = vsel %vm533_vm12, %v955_v21, 0  ;;  %774 = vmatpush.bf16.msra.mxu3 %v549_v22 }
  0x1f   : > { %554 = vrot.lane.b32.xlu1 %v548_v23, %s1024_s20 }
  0x21   : > { %948 = vmatmul.msk.bf16.vlgmr.msra.gmra.mxu3 %vm763_vm15, %v960_v33 }
  0x26   : > { %565 = vrot.lane.b32.xlu0 %v1107_v12, %s1025_s24 }
  0x27   : > { %556 = vrot.lane.b32.xlu1 %v549_v22, %s1024_s20 }
  0x70   : > { %v1125_v26 = vpop.permute.xlu2 %558 }
  0x90   : > { %v564_v24 = vpop.permute.xlu0 %563 }
  0x91   : > { %v555_v25 = vpop.permute.xlu1 %554  ;;  %600 = vrot.lane.b32.xlu2 %v564_v24, %s1026_s25 }
  0x98   : > { %v566_v27 = vpop.permute.xlu0 %565 }
  0x99   : > { %v557_v28 = vpop.permute.xlu1 %556  ;;  %v568_v29 = vsel %vm567_vm13, %v564_v24, %v566_v27 }
  0x9a   : > { %602 = vrot.lane.b32.xlu0 %v568_v29, %s1026_s25  ;;  %v562_v30 = vsel %vm560_vm14, %v557_v28, %v1125_v26  ;;  %v561_v31 = vsel %vm560_vm14, %v555_v25, %v557_v28 }
  0x9b   : > { %596 = vrot.lane.b32.xlu2 %v562_v30, %s1026_s25  ;;  %594 = vrot.lane.b32.xlu1 %v561_v31, %s1026_s25 }
  0xa2   : > { %588 = vrot.lane.b32.xlu0 %v548_v23, %s1026_s25 }
  0xa3   : > { %590 = vrot.lane.b32.xlu1 %v549_v22, %s1026_s25  ;;  %575 = vperm.xlu2 %995, %v571_v37  }
  0xa4   : > { %v776_v15 = vpop.f32.mrf.mxu3 }
  0xaa   : > { %580 = vperm.xlu0 %996, %v572_v32  }
  0xac   : > { %v778_v22 = vpop.f32.mrf.mxu3 }
  0xb2   : > { %604 = vrot.lane.b32.xlu0 %v566_v27, %s1026_s25 }
  0xba   : > { %712 = vperm.xlu0 %996, %v708_v34  }
  0xc2   : > { %755 = vperm.xlu0 %996, %v747_v36  }
  0xeb   : > { %v601_v35 = vpop.permute.xlu2 %600 }
  0xf5   : > { %v597_v41 = vpop.permute.xlu2 %596 }
  0xfd   : > { %v576_v51 = vpop.permute.xlu2 %575 }
 0x10c   : > { %v603_v38 = vpop.permute.xlu0 %602 }
 0x10d   : > { %v595_v39 = vpop.permute.xlu1 %594  ;;  %v611_v40 = vsel %vm606_vm0, %v601_v35, %v603_v38 }
 0x10e   : > { %628 = vmatpush.bf16.msra.mxu0 %v611_v40  ;;  %v609_v42 = vsel %vm606_vm0, %v595_v39, %v597_v41 }
 0x112   : > { %629 = vmatpush.bf16.msra.mxu0 %v609_v42 }
 0x114   : > { %v589_v43 = vpop.permute.xlu0 %588 }
 0x115   : > { %v591_v44 = vpop.permute.xlu1 %590 }
 0x116   : > { %v607_v45 = vsel %vm606_vm0, %v589_v43, %v591_v44 }
 0x117   : > { %630 = vmatpush.bf16.msra.mxu0 %v607_v45 }
 0x11a   : > { %937 = vmatmul.msk.bf16.vlgmr.msra.gmra.mxu0 %vm619_vm1, %v958_v46 }
 0x11c   : > { %v581_v47 = vpop.permute.xlu0 %580 }
 0x124   : > { %v605_v48 = vpop.permute.xlu0 %604 }
 0x125   : > { %v612_v49 = vsel %vm606_vm0, %v603_v38, %v605_v48 }
 0x126   : > { %642 = vmatpush.bf16.msra.mxu1 %v612_v49 }
 0x12c   : > { %v713_v16 = vpop.permute.xlu0 %712 }
 0x134   : > { %v756_v24 = vpop.permute.xlu0 %755 }
 0x135   : > { %v779_v29 = vadd.f32 %v778_v22, %v756_v24 }
 0x197   : > { %v632_v52 = vpop.f32.mrf.mxu0 }
 0x198   : > { %v633_v53 = vadd.f32 %v632_v52, %v576_v51 }
 0x19a   : > { %vm655_vm3 = vcmp.gt.f32.partialorder %v633_v53, 0.0 }
 0x19b   : > { %vm665_vm4 = vmand %vm655_vm3, %vm659_vm2 }
 0x19c   : > { %vm675_vm6 = vmand %vm665_vm4, %vm669_vm5 }
 0x19d   : > { %v679_v56 = vsel %vm675_vm6, %v633_v53, 0.0 }
 0x19e   : > { %v683_v57 = vpack.c.bf16 0.0, %v679_v56 }
 0x19f   : > { %v634_v54 = vpop.f32.mrf.mxu0 }
 0x1a0   : > { %v635_v55 = vadd.f32 %v634_v54, %v581_v47  ;;  %v687_v60 = vunpack.c.l.b16 %v683_v57  ;;  %v691_v61 = vunpack.c.h.b16 %v683_v57 }
 0x1a2   : > { %vm657_vm7 = vcmp.gt.f32.partialorder %v635_v55, 0.0 }
 0x1a3   : > { %vm667_vm8 = vmand %vm657_vm7, %vm659_vm2 }
 0x1a4   : > { %vm677_vm9 = vmand %vm667_vm8, %vm669_vm5 }
 0x1a5   : > { %v681_v58 = vsel %vm677_vm9, %v635_v55, 0.0 }
 0x1a6   : > { %v684_v59 = vpack.c.bf16 0.0, %v681_v58 }
 0x1a8   : > { %v688_v62 = vunpack.c.l.b16 %v684_v59  ;;  %v692_v63 = vunpack.c.h.b16 %v684_v59 }
 0x1aa   : > { %v693_v0 = vpack.c.b16 %v692_v63, %v691_v61  ;;  %v689_v1 = vpack.c.b16 %v688_v62, %v687_v60 }
 0x1ac   : > { %702 = vrot.lane.b32.xlu2 %v693_v0, %s1025_s24  ;;  %700 = vrot.lane.b32.xlu1 %v689_v1, %s1025_s24 }
 0x1b4   : > { %696 = vrot.lane.b32.xlu2 %v693_v0, %s1024_s20  ;;  %694 = vrot.lane.b32.xlu1 %v689_v1, %s1024_s20 }
 0x1bc   : > { %592 = vrot.lane.b32.xlu2 %v1107_v12, %s1026_s25  ;;  %598 = vrot.lane.b32.xlu1 %v1125_v26, %s1026_s25 }
 0x1c4   : > { %750 = vperm.xlu2 %995, %v746_v2   ;;  %717 = vperm.xlu1 %997, %v709_v3  }
 0x206   : > { %v703_v4 = vpop.permute.xlu2 %702 }
 0x20e   : > { %v697_v7 = vpop.permute.xlu2 %696 }
 0x216   : > { %v593_v13 = vpop.permute.xlu2 %592 }
 0x217   : > { %v608_v14 = vsel %vm606_vm0, %v591_v44, %v593_v13 }
 0x21e   : > { %v701_v5 = vpop.permute.xlu1 %700  ;;  %v751_v20 = vpop.permute.xlu2 %750 }
 0x21f   : > { %v704_v6 = vsel %vm567_vm13, %v701_v5, %v703_v4  ;;  %v777_v26 = vadd.f32 %v776_v15, %v751_v20 }
 0x220   : > { %733 = vmatpush.bf16.msra.mxu2 %v704_v6 }
 0x226   : > { %v695_v8 = vpop.permute.xlu1 %694 }
 0x227   : > { %v698_v9 = vsel %vm560_vm14, %v695_v8, %v697_v7 }
 0x228   : > { %734 = vmatpush.bf16.msra.mxu2 %v698_v9 }
 0x22c   : > { %735 = vmatpush.bf16.msra.mxu2 %v689_v1 }
 0x22e   : > { %v599_v11 = vpop.permute.xlu1 %598 }
 0x22f   : > { %943 = vmatmul.msk.bf16.vlgmr.msra.gmra.mxu2 %vm619_vm1, %v959_v10  ;;  %v610_v12 = vsel %vm606_vm0, %v597_v41, %v599_v11 }
 0x230   : > { %643 = vmatpush.bf16.msra.mxu1 %v610_v12 }
 0x234   : > { %644 = vmatpush.bf16.msra.mxu1 %v608_v14 }
 0x236   : > { %v718_v21 = vpop.permute.xlu1 %717 }
 0x237   : > { %938 = vmatmul.msk.bf16.vlgmr.msra.gmra.mxu1 %vm619_vm1, %v958_v46 }
 0x2b2   : > { %v737_v17 = vpop.f32.mrf.mxu2 }
 0x2b3   : > { %v738_v19 = vadd.f32 %v737_v17, %v713_v16 }
 0x2b4   : > { %v646_v18 = vpop.f32.mrf.mxu1 }
 0x2b5   : > { %v742_v23 = vmax.f32 %v738_v19, 0.0 }
 0x2b7   : > { %v781_v30 = vadd.f32 %v777_v26, %v742_v23 }
 0x2b9   : > { %v783_v33 = vmax.f32 %v781_v30, 0.0 }
 0x2ba   : > { %v739_v25 = vpop.f32.mrf.mxu2 }
 0x2bb   : > { %v740_v27 = vadd.f32 %v739_v25, %v718_v21 }
 0x2bc   : > { %v648_v28 = vpop.f32.mrf.mxu1 }
 0x2bd   : > { %v743_v31 = vmax.f32 %v740_v27, 0.0 }
 0x2bf   : > { %v782_v32 = vadd.f32 %v779_v29, %v743_v31 }
 0x2c1   : > { %v784_v34 = vmax.f32 %v782_v32, 0.0 }
 0x2c3   : > { %v964_v35 = vpack.c.bf16 %v784_v34, %v783_v33 }
 0x2c5   : > { %965 = vst [vmem:[%s467_s29] sm:$0xff] %v964_v35  }
 0x2c6 PF: > { %s19_s11 = sadd.s32 1, %s1020_s11   ;;  %s1207_s30 = smov %s1016_s10 }
 0x2c7   : > { %p16_p5 = scmp.ge.s32.totalorder %s19_s11, 4   ;;  %s1208_s10 = smov %s1210_s12 }
 0x2c9   :  { %18 = sbr.rel (!%p16_p5) target bundleno = 2 (0x2), region = 92 }

</bundles_post_ra>
